<compile_context>
chip_gen: v6e
topology: v6e:2x2x1
jax: 0.10.0
libtpu: 0.0.40
codegen_flags: <defaults>
</compile_context>

<pallas_src>
import jax
import jax.numpy as jnp
import numpy as np
from jax import lax
from jax.experimental import pallas as pl
from jax.experimental.pallas import tpu as pltpu

INPUT_SIZE = 28
HIDDEN = 64
OUT_FEATURES = 10

LANE = 128          # TPU lane width
SUBLANE = 8         # TPU sublane width (f32)
OUT_PAD = LANE      # padded linear-head output dim (lane-dense store)


def _round_up(x, m):
    return ((x + m - 1) // m) * m


def make_lstm_kernel(T, Bp):
    """Single-invocation LSTM + linear-head kernel (everything VMEM-resident)."""
    H = HIDDEN

    def kernel(x_ref, wih_ref, whh_ref, b_ref, wout_ref, bout_ref,
               out_ref, xp_sc):
        # (1) Input projection for ALL time steps in one batched MXU pass:
        #     (T*Bp, 28) @ (28, 4H) + bias  -> VMEM scratch (T*Bp, 256).
        xp_sc[...] = (
            jnp.dot(x_ref[...], wih_ref[...],
                    preferred_element_type=jnp.float32)
            + b_ref[...])

        # Lane-masked scale so tanh(g) can ride in the same sigmoid slab as o:
        # gates are packed [i|f] (cols 0:128) and [g|o] (cols 128:256).
        lane = lax.broadcasted_iota(jnp.int32, (Bp, 2 * H), 1)
        g_scale = jnp.where(lane < H, 2.0, 1.0).astype(jnp.float32)

        # (2) Serial recurrence; h/c are (Bp, 64) loop-carried values.
        def step(t, carry):
            h_prev, c_prev = carry
            gates = (xp_sc[pl.ds(t * Bp, Bp), :]
                     + jnp.dot(h_prev, whh_ref[...],
                               preferred_element_type=jnp.float32))
            if_blk = gates[:, 0:2 * H]        # [i | f]  (both sigmoid)
            go_blk = gates[:, 2 * H:4 * H]    # [g | o]  (tanh(g), sigmoid(o))
            if_s = jax.nn.sigmoid(if_blk)                 # 1 EUP slab
            go_s = jax.nn.sigmoid(go_blk * g_scale)       # 1 EUP slab
            i_g = if_s[:, :H]
            f_g = if_s[:, H:]
            g_g = 2.0 * go_s[:, :H] - 1.0     # tanh(g) = 2*sigmoid(2g) - 1
            o_g = go_s[:, H:]
            c_new = f_g * c_prev + i_g * g_g
            h_new = o_g * jnp.tanh(c_new)                 # 1 EUP slab
            return (h_new, c_new)

        h0 = jnp.zeros((Bp, H), jnp.float32)
        c0 = jnp.zeros((Bp, H), jnp.float32)
        unroll = T if T <= 16 else 8
        h_last, _ = lax.fori_loop(0, T, step, (h0, c0), unroll=unroll)

        # (3) Linear head on the last hidden state (padded out lanes are zero).
        out_ref[...] = (
            jnp.dot(h_last, wout_ref[...],
                    preferred_element_type=jnp.float32)
            + bout_ref[...])

    return kernel


def rnn_forward(x, params):
    """x: (B, T, I) float32 (batch_first, like the PyTorch module). Returns (B, 10)."""
    B, T, I = x.shape
    H = HIDDEN
    Bp = _round_up(max(B, SUBLANE), SUBLANE)

    # Time-major, batch padded to a sublane multiple (feature dim NOT padded),
    # flattened to (T*Bp, I) so the kernel can do one big input-projection matmul.
    x_tm = jnp.transpose(x, (1, 0, 2))                               # (T, B, I)
    x_pad = jnp.zeros((T, Bp, I), jnp.float32).at[:, :B, :].set(x_tm)
    x_flat = x_pad.reshape(T * Bp, I)

    # Compact weights, pre-transposed to (in, out); PyTorch gate order kept.
    wih_c = params["w_ih"].T.astype(jnp.float32)                     # (I, 4H)
    whh_c = params["w_hh"].T.astype(jnp.float32)                     # (H, 4H)
    bias_c = (params["b_ih"] + params["b_hh"]).reshape(1, 4 * H)     # (1, 4H)
    bias_c = bias_c.astype(jnp.float32)
    wout_p = (jnp.zeros((H, OUT_PAD), jnp.float32)
              .at[:, :OUT_FEATURES].set(params["w_out"].T))          # (H, OUT_PAD)
    bout_p = (jnp.zeros((1, OUT_PAD), jnp.float32)
              .at[0, :OUT_FEATURES].set(params["b_out"]))            # (1, OUT_PAD)

    kernel = make_lstm_kernel(T, Bp)
    vmem_spec = pl.BlockSpec(memory_space=pltpu.MemorySpace.VMEM)

    out_p = pl.pallas_call(
        kernel,
        out_shape=jax.ShapeDtypeStruct((Bp, OUT_PAD), jnp.float32),
        in_specs=[vmem_spec] * 6,
        out_specs=vmem_spec,
        scratch_shapes=[
            pltpu.VMEM((T * Bp, 4 * H), jnp.float32),   # precomputed x-projection
        ],
    )(x_flat, wih_c, whh_c, bias_c, wout_p, bout_p)

    # Padded batch rows (B..Bp) carry bias-driven garbage; always slice them off.
    return out_p[:B, :OUT_FEATURES]


def rnn_reference(x, params):
    """Pure-JAX reference of the same forward pass (for correctness check)."""
    B, T, I = x.shape
    H = HIDDEN
    w_ih_t = params["w_ih"].T
    w_hh_t = params["w_hh"].T
    bias = params["b_ih"] + params["b_hh"]

    def step(carry, x_t):
        h, c = carry
        gates = x_t @ w_ih_t + h @ w_hh_t + bias
        i_g = jax.nn.sigmoid(gates[:, 0 * H:1 * H])
        f_g = jax.nn.sigmoid(gates[:, 1 * H:2 * H])
        g_g = jnp.tanh(gates[:, 2 * H:3 * H])
        o_g = jax.nn.sigmoid(gates[:, 3 * H:4 * H])
        c = f_g * c + i_g * g_g
        h = o_g * jnp.tanh(c)
        return (h, c), None

    h0 = jnp.zeros((B, H), jnp.float32)
    c0 = jnp.zeros((B, H), jnp.float32)
    (h_last, _), _ = lax.scan(step, (h0, c0), jnp.transpose(x, (1, 0, 2)))
    return h_last @ params["w_out"].T + params["b_out"]


def init_params(key):
    """Deterministic init matching PyTorch LSTM/Linear shapes (uniform ±1/sqrt(H))."""
    H, I = HIDDEN, INPUT_SIZE
    k = 1.0 / np.sqrt(H)
    keys = jax.random.split(key, 6)
    u = lambda kk, shape, bound: jax.random.uniform(
        kk, shape, jnp.float32, minval=-bound, maxval=bound)
    return {
        "w_ih": u(keys[0], (4 * H, I), k),          # weight_ih_l0
        "w_hh": u(keys[1], (4 * H, H), k),          # weight_hh_l0
        "b_ih": u(keys[2], (4 * H,), k),            # bias_ih_l0
        "b_hh": u(keys[3], (4 * H,), k),            # bias_hh_l0
        "w_out": u(keys[4], (OUT_FEATURES, H), 1.0 / np.sqrt(H)),  # Linear weight
        "b_out": u(keys[5], (OUT_FEATURES,), 1.0 / np.sqrt(H)),    # Linear bias
    }


if __name__ == "__main__":
    key = jax.random.PRNGKey(0)
    k_param, k_x = jax.random.split(key)
    params = init_params(k_param)

    B, T = 4, 8
    x = jax.random.normal(k_x, (B, T, INPUT_SIZE), jnp.float32)

    out = jax.block_until_ready(rnn_forward(x, params))

    ref = rnn_reference(x, params)
    np.testing.assert_allclose(np.asarray(out), np.asarray(ref),
                               rtol=1e-4, atol=1e-4)
    print("KERNEL_OK")
</pallas_src>

<mosaic_0001>
module attributes {stable_mosaic.version = 11 : i64} {
  func.func @kernel(%arg0: memref<64x28xf32, #tpu.memory_space<vmem>>, %arg1: memref<28x256xf32, #tpu.memory_space<vmem>>, %arg2: memref<64x256xf32, #tpu.memory_space<vmem>>, %arg3: memref<1x256xf32, #tpu.memory_space<vmem>>, %arg4: memref<64x128xf32, #tpu.memory_space<vmem>>, %arg5: memref<1x128xf32, #tpu.memory_space<vmem>>, %arg6: memref<8x128xf32, #tpu.memory_space<vmem>>, %arg7: memref<64x256xf32, #tpu.memory_space<vmem>>) attributes {dimension_semantics = [], scalar_prefetch = 0 : i64, scratch_operands = 1 : i64, tpu.core_type = #tpu.core_type<tc>} {
    %c0 = arith.constant 0 : index
    %c0_0 = arith.constant 0 : index
    %0 = vector.load %arg0[%c0, %c0_0] : memref<64x28xf32, #tpu.memory_space<vmem>>, vector<64x28xf32>
    %c0_1 = arith.constant 0 : index
    %c0_2 = arith.constant 0 : index
    %1 = vector.load %arg1[%c0_1, %c0_2] : memref<28x256xf32, #tpu.memory_space<vmem>>, vector<28x256xf32>
    %cst = arith.constant dense<0.000000e+00> : vector<64x256xf32>
    %2 = tpu.matmul %0, %1, %cst {dimension_numbers = #tpu.dot_dimension_numbers<[1], [0], [0], [1], [0, 0, 1, 1], [], []>} : vector<64x28xf32>, vector<28x256xf32>, vector<64x256xf32> -> vector<64x256xf32>
    %c0_3 = arith.constant 0 : index
    %c0_4 = arith.constant 0 : index
    %3 = vector.load %arg3[%c0_3, %c0_4] : memref<1x256xf32, #tpu.memory_space<vmem>>, vector<1x256xf32>
    %4 = vector.broadcast %3 : vector<1x256xf32> to vector<64x256xf32>
    %5 = arith.addf %2, %4 : vector<64x256xf32>
    %c0_5 = arith.constant 0 : index
    %c0_6 = arith.constant 0 : index
    %6 = vector.load %arg7[%c0_5, %c0_6] : memref<64x256xf32, #tpu.memory_space<vmem>>, vector<64x256xf32>
    tpu.vector_store %arg7[%c0_5, %c0_6], %5 {strides = array<i32>} : memref<64x256xf32, #tpu.memory_space<vmem>>, vector<64x256xf32>,
    %7 = tpu.iota {dimensions = array<i32: 1>} : vector<8x128xi32>
    %c64_i32 = arith.constant 64 : i32
    %8 = vector.broadcast %c64_i32 : i32 to vector<8x128xi32>
    %9 = arith.cmpi slt, %7, %8 : vector<8x128xi32>
    %cst_7 = arith.constant 2.000000e+00 : f32
    %cst_8 = arith.constant 1.000000e+00 : f32
    %10 = vector.broadcast %cst_7 : f32 to vector<8x128xf32>
    %11 = vector.broadcast %cst_8 : f32 to vector<8x128xf32>
    %12 = arith.select %9, %10, %11 : vector<8x128xi1>, vector<8x128xf32>
    %cst_9 = arith.constant 0.000000e+00 : f32
    %13 = vector.broadcast %cst_9 : f32 to vector<8x64xf32>
    %cst_10 = arith.constant 0.000000e+00 : f32
    %14 = vector.broadcast %cst_10 : f32 to vector<8x64xf32>
    %c0_i32 = arith.constant 0 : i32
    %c8_i32 = arith.constant 8 : i32
    %15 = arith.muli %c0_i32, %c8_i32 : i32
    %16 = arith.index_cast %15 : i32 to index
    %c0_11 = arith.constant 0 : index
    %17 = vector.load %arg7[%16, %c0_11] : memref<64x256xf32, #tpu.memory_space<vmem>>, vector<8x256xf32>
    %c0_12 = arith.constant 0 : index
    %c0_13 = arith.constant 0 : index
    %18 = vector.load %arg2[%c0_12, %c0_13] : memref<64x256xf32, #tpu.memory_space<vmem>>, vector<64x256xf32>
    %cst_14 = arith.constant dense<0.000000e+00> : vector<8x256xf32>
    %19 = tpu.matmul %13, %18, %cst_14 {dimension_numbers = #tpu.dot_dimension_numbers<[1], [0], [0], [1], [0, 0, 1, 1], [], []>} : vector<8x64xf32>, vector<64x256xf32>, vector<8x256xf32> -> vector<8x256xf32>
    %20 = arith.addf %17, %19 : vector<8x256xf32>
    %21 = vector.extract_strided_slice %20 {offsets = [0, 0], sizes = [8, 128], strides = [1, 1]} : vector<8x256xf32> to vector<8x128xf32>
    %22 = vector.extract_strided_slice %20 {offsets = [0, 128], sizes = [8, 128], strides = [1, 1]} : vector<8x256xf32> to vector<8x128xf32>
    %23 = arith.negf %21 : vector<8x128xf32>
    %24 = math.exp %23 : vector<8x128xf32>
    %cst_15 = arith.constant 1.000000e+00 : f32
    %25 = vector.broadcast %cst_15 : f32 to vector<8x128xf32>
    %26 = arith.addf %25, %24 : vector<8x128xf32>
    %27 = arith.divf %25, %26 : vector<8x128xf32>
    %28 = arith.mulf %22, %12 : vector<8x128xf32>
    %29 = arith.negf %28 : vector<8x128xf32>
    %30 = math.exp %29 : vector<8x128xf32>
    %cst_16 = arith.constant 1.000000e+00 : f32
    %31 = vector.broadcast %cst_16 : f32 to vector<8x128xf32>
    %32 = arith.addf %31, %30 : vector<8x128xf32>
    %33 = arith.divf %31, %32 : vector<8x128xf32>
    %34 = vector.extract_strided_slice %27 {offsets = [0, 0], sizes = [8, 64], strides = [1, 1]} : vector<8x128xf32> to vector<8x64xf32>
    %35 = vector.extract_strided_slice %27 {offsets = [0, 64], sizes = [8, 64], strides = [1, 1]} : vector<8x128xf32> to vector<8x64xf32>
    %36 = vector.extract_strided_slice %33 {offsets = [0, 0], sizes = [8, 64], strides = [1, 1]} : vector<8x128xf32> to vector<8x64xf32>
    %cst_17 = arith.constant 2.000000e+00 : f32
    %37 = vector.broadcast %cst_17 : f32 to vector<8x64xf32>
    %38 = arith.mulf %37, %36 : vector<8x64xf32>
    %cst_18 = arith.constant 1.000000e+00 : f32
    %39 = vector.broadcast %cst_18 : f32 to vector<8x64xf32>
    %40 = arith.subf %38, %39 : vector<8x64xf32>
    %41 = vector.extract_strided_slice %33 {offsets = [0, 64], sizes = [8, 64], strides = [1, 1]} : vector<8x128xf32> to vector<8x64xf32>
    %42 = arith.mulf %35, %14 : vector<8x64xf32>
    %43 = arith.mulf %34, %40 : vector<8x64xf32>
    %44 = arith.addf %42, %43 : vector<8x64xf32>
    %45 = math.tanh %44 : vector<8x64xf32>
    %46 = arith.mulf %41, %45 : vector<8x64xf32>
    %c1_i32 = arith.constant 1 : i32
    %c8_i32_19 = arith.constant 8 : i32
    %47 = arith.muli %c1_i32, %c8_i32_19 : i32
    %48 = arith.index_cast %47 : i32 to index
    %c0_20 = arith.constant 0 : index
    %49 = vector.load %arg7[%48, %c0_20] : memref<64x256xf32, #tpu.memory_space<vmem>>, vector<8x256xf32>
    %c0_21 = arith.constant 0 : index
    %c0_22 = arith.constant 0 : index
    %50 = vector.load %arg2[%c0_21, %c0_22] : memref<64x256xf32, #tpu.memory_space<vmem>>, vector<64x256xf32>
    %cst_23 = arith.constant dense<0.000000e+00> : vector<8x256xf32>
    %51 = tpu.matmul %46, %50, %cst_23 {dimension_numbers = #tpu.dot_dimension_numbers<[1], [0], [0], [1], [0, 0, 1, 1], [], []>} : vector<8x64xf32>, vector<64x256xf32>, vector<8x256xf32> -> vector<8x256xf32>
    %52 = arith.addf %49, %51 : vector<8x256xf32>
    %53 = vector.extract_strided_slice %52 {offsets = [0, 0], sizes = [8, 128], strides = [1, 1]} : vector<8x256xf32> to vector<8x128xf32>
    %54 = vector.extract_strided_slice %52 {offsets = [0, 128], sizes = [8, 128], strides = [1, 1]} : vector<8x256xf32> to vector<8x128xf32>
    %55 = arith.negf %53 : vector<8x128xf32>
    %56 = math.exp %55 : vector<8x128xf32>
    %cst_24 = arith.constant 1.000000e+00 : f32
    %57 = vector.broadcast %cst_24 : f32 to vector<8x128xf32>
    %58 = arith.addf %57, %56 : vector<8x128xf32>
    %59 = arith.divf %57, %58 : vector<8x128xf32>
    %60 = arith.mulf %54, %12 : vector<8x128xf32>
    %61 = arith.negf %60 : vector<8x128xf32>
    %62 = math.exp %61 : vector<8x128xf32>
    %cst_25 = arith.constant 1.000000e+00 : f32
    %63 = vector.broadcast %cst_25 : f32 to vector<8x128xf32>
    %64 = arith.addf %63, %62 : vector<8x128xf32>
    %65 = arith.divf %63, %64 : vector<8x128xf32>
    %66 = vector.extract_strided_slice %59 {offsets = [0, 0], sizes = [8, 64], strides = [1, 1]} : vector<8x128xf32> to vector<8x64xf32>
    %67 = vector.extract_strided_slice %59 {offsets = [0, 64], sizes = [8, 64], strides = [1, 1]} : vector<8x128xf32> to vector<8x64xf32>
    %68 = vector.extract_strided_slice %65 {offsets = [0, 0], sizes = [8, 64], strides = [1, 1]} : vector<8x128xf32> to vector<8x64xf32>
    %cst_26 = arith.constant 2.000000e+00 : f32
    %69 = vector.broadcast %cst_26 : f32 to vector<8x64xf32>
    %70 = arith.mulf %69, %68 : vector<8x64xf32>
    %cst_27 = arith.constant 1.000000e+00 : f32
    %71 = vector.broadcast %cst_27 : f32 to vector<8x64xf32>
    %72 = arith.subf %70, %71 : vector<8x64xf32>
    %73 = vector.extract_strided_slice %65 {offsets = [0, 64], sizes = [8, 64], strides = [1, 1]} : vector<8x128xf32> to vector<8x64xf32>
    %74 = arith.mulf %67, %44 : vector<8x64xf32>
    %75 = arith.mulf %66, %72 : vector<8x64xf32>
    %76 = arith.addf %74, %75 : vector<8x64xf32>
    %77 = math.tanh %76 : vector<8x64xf32>
    %78 = arith.mulf %73, %77 : vector<8x64xf32>
    %c2_i32 = arith.constant 2 : i32
    %c8_i32_28 = arith.constant 8 : i32
    %79 = arith.muli %c2_i32, %c8_i32_28 : i32
    %80 = arith.index_cast %79 : i32 to index
    %c0_29 = arith.constant 0 : index
    %81 = vector.load %arg7[%80, %c0_29] : memref<64x256xf32, #tpu.memory_space<vmem>>, vector<8x256xf32>
    %c0_30 = arith.constant 0 : index
    %c0_31 = arith.constant 0 : index
    %82 = vector.load %arg2[%c0_30, %c0_31] : memref<64x256xf32, #tpu.memory_space<vmem>>, vector<64x256xf32>
    %cst_32 = arith.constant dense<0.000000e+00> : vector<8x256xf32>
    %83 = tpu.matmul %78, %82, %cst_32 {dimension_numbers = #tpu.dot_dimension_numbers<[1], [0], [0], [1], [0, 0, 1, 1], [], []>} : vector<8x64xf32>, vector<64x256xf32>, vector<8x256xf32> -> vector<8x256xf32>
    %84 = arith.addf %81, %83 : vector<8x256xf32>
    %85 = vector.extract_strided_slice %84 {offsets = [0, 0], sizes = [8, 128], strides = [1, 1]} : vector<8x256xf32> to vector<8x128xf32>
    %86 = vector.extract_strided_slice %84 {offsets = [0, 128], sizes = [8, 128], strides = [1, 1]} : vector<8x256xf32> to vector<8x128xf32>
    %87 = arith.negf %85 : vector<8x128xf32>
    %88 = math.exp %87 : vector<8x128xf32>
    %cst_33 = arith.constant 1.000000e+00 : f32
    %89 = vector.broadcast %cst_33 : f32 to vector<8x128xf32>
    %90 = arith.addf %89, %88 : vector<8x128xf32>
    %91 = arith.divf %89, %90 : vector<8x128xf32>
    %92 = arith.mulf %86, %12 : vector<8x128xf32>
    %93 = arith.negf %92 : vector<8x128xf32>
    %94 = math.exp %93 : vector<8x128xf32>
    %cst_34 = arith.constant 1.000000e+00 : f32
    %95 = vector.broadcast %cst_34 : f32 to vector<8x128xf32>
    %96 = arith.addf %95, %94 : vector<8x128xf32>
    %97 = arith.divf %95, %96 : vector<8x128xf32>
    %98 = vector.extract_strided_slice %91 {offsets = [0, 0], sizes = [8, 64], strides = [1, 1]} : vector<8x128xf32> to vector<8x64xf32>
    %99 = vector.extract_strided_slice %91 {offsets = [0, 64], sizes = [8, 64], strides = [1, 1]} : vector<8x128xf32> to vector<8x64xf32>
    %100 = vector.extract_strided_slice %97 {offsets = [0, 0], sizes = [8, 64], strides = [1, 1]} : vector<8x128xf32> to vector<8x64xf32>
    %cst_35 = arith.constant 2.000000e+00 : f32
    %101 = vector.broadcast %cst_35 : f32 to vector<8x64xf32>
    %102 = arith.mulf %101, %100 : vector<8x64xf32>
    %cst_36 = arith.constant 1.000000e+00 : f32
    %103 = vector.broadcast %cst_36 : f32 to vector<8x64xf32>
    %104 = arith.subf %102, %103 : vector<8x64xf32>
    %105 = vector.extract_strided_slice %97 {offsets = [0, 64], sizes = [8, 64], strides = [1, 1]} : vector<8x128xf32> to vector<8x64xf32>
    %106 = arith.mulf %99, %76 : vector<8x64xf32>
    %107 = arith.mulf %98, %104 : vector<8x64xf32>
    %108 = arith.addf %106, %107 : vector<8x64xf32>
    %109 = math.tanh %108 : vector<8x64xf32>
    %110 = arith.mulf %105, %109 : vector<8x64xf32>
    %c3_i32 = arith.constant 3 : i32
    %c8_i32_37 = arith.constant 8 : i32
    %111 = arith.muli %c3_i32, %c8_i32_37 : i32
    %112 = arith.index_cast %111 : i32 to index
    %c0_38 = arith.constant 0 : index
    %113 = vector.load %arg7[%112, %c0_38] : memref<64x256xf32, #tpu.memory_space<vmem>>, vector<8x256xf32>
    %c0_39 = arith.constant 0 : index
    %c0_40 = arith.constant 0 : index
    %114 = vector.load %arg2[%c0_39, %c0_40] : memref<64x256xf32, #tpu.memory_space<vmem>>, vector<64x256xf32>
    %cst_41 = arith.constant dense<0.000000e+00> : vector<8x256xf32>
    %115 = tpu.matmul %110, %114, %cst_41 {dimension_numbers = #tpu.dot_dimension_numbers<[1], [0], [0], [1], [0, 0, 1, 1], [], []>} : vector<8x64xf32>, vector<64x256xf32>, vector<8x256xf32> -> vector<8x256xf32>
    %116 = arith.addf %113, %115 : vector<8x256xf32>
    %117 = vector.extract_strided_slice %116 {offsets = [0, 0], sizes = [8, 128], strides = [1, 1]} : vector<8x256xf32> to vector<8x128xf32>
    %118 = vector.extract_strided_slice %116 {offsets = [0, 128], sizes = [8, 128], strides = [1, 1]} : vector<8x256xf32> to vector<8x128xf32>
    %119 = arith.negf %117 : vector<8x128xf32>
    %120 = math.exp %119 : vector<8x128xf32>
    %cst_42 = arith.constant 1.000000e+00 : f32
    %121 = vector.broadcast %cst_42 : f32 to vector<8x128xf32>
    %122 = arith.addf %121, %120 : vector<8x128xf32>
    %123 = arith.divf %121, %122 : vector<8x128xf32>
    %124 = arith.mulf %118, %12 : vector<8x128xf32>
    %125 = arith.negf %124 : vector<8x128xf32>
    %126 = math.exp %125 : vector<8x128xf32>
    %cst_43 = arith.constant 1.000000e+00 : f32
    %127 = vector.broadcast %cst_43 : f32 to vector<8x128xf32>
    %128 = arith.addf %127, %126 : vector<8x128xf32>
    %129 = arith.divf %127, %128 : vector<8x128xf32>
    %130 = vector.extract_strided_slice %123 {offsets = [0, 0], sizes = [8, 64], strides = [1, 1]} : vector<8x128xf32> to vector<8x64xf32>
    %131 = vector.extract_strided_slice %123 {offsets = [0, 64], sizes = [8, 64], strides = [1, 1]} : vector<8x128xf32> to vector<8x64xf32>
    %132 = vector.extract_strided_slice %129 {offsets = [0, 0], sizes = [8, 64], strides = [1, 1]} : vector<8x128xf32> to vector<8x64xf32>
    %cst_44 = arith.constant 2.000000e+00 : f32
    %133 = vector.broadcast %cst_44 : f32 to vector<8x64xf32>
    %134 = arith.mulf %133, %132 : vector<8x64xf32>
    %cst_45 = arith.constant 1.000000e+00 : f32
    %135 = vector.broadcast %cst_45 : f32 to vector<8x64xf32>
    %136 = arith.subf %134, %135 : vector<8x64xf32>
    %137 = vector.extract_strided_slice %129 {offsets = [0, 64], sizes = [8, 64], strides = [1, 1]} : vector<8x128xf32> to vector<8x64xf32>
    %138 = arith.mulf %131, %108 : vector<8x64xf32>
    %139 = arith.mulf %130, %136 : vector<8x64xf32>
    %140 = arith.addf %138, %139 : vector<8x64xf32>
    %141 = math.tanh %140 : vector<8x64xf32>
    %142 = arith.mulf %137, %141 : vector<8x64xf32>
    %c4_i32 = arith.constant 4 : i32
    %c8_i32_46 = arith.constant 8 : i32
    %143 = arith.muli %c4_i32, %c8_i32_46 : i32
    %144 = arith.index_cast %143 : i32 to index
    %c0_47 = arith.constant 0 : index
    %145 = vector.load %arg7[%144, %c0_47] : memref<64x256xf32, #tpu.memory_space<vmem>>, vector<8x256xf32>
    %c0_48 = arith.constant 0 : index
    %c0_49 = arith.constant 0 : index
    %146 = vector.load %arg2[%c0_48, %c0_49] : memref<64x256xf32, #tpu.memory_space<vmem>>, vector<64x256xf32>
    %cst_50 = arith.constant dense<0.000000e+00> : vector<8x256xf32>
    %147 = tpu.matmul %142, %146, %cst_50 {dimension_numbers = #tpu.dot_dimension_numbers<[1], [0], [0], [1], [0, 0, 1, 1], [], []>} : vector<8x64xf32>, vector<64x256xf32>, vector<8x256xf32> -> vector<8x256xf32>
    %148 = arith.addf %145, %147 : vector<8x256xf32>
    %149 = vector.extract_strided_slice %148 {offsets = [0, 0], sizes = [8, 128], strides = [1, 1]} : vector<8x256xf32> to vector<8x128xf32>
    %150 = vector.extract_strided_slice %148 {offsets = [0, 128], sizes = [8, 128], strides = [1, 1]} : vector<8x256xf32> to vector<8x128xf32>
    %151 = arith.negf %149 : vector<8x128xf32>
    %152 = math.exp %151 : vector<8x128xf32>
    %cst_51 = arith.constant 1.000000e+00 : f32
    %153 = vector.broadcast %cst_51 : f32 to vector<8x128xf32>
    %154 = arith.addf %153, %152 : vector<8x128xf32>
    %155 = arith.divf %153, %154 : vector<8x128xf32>
    %156 = arith.mulf %150, %12 : vector<8x128xf32>
    %157 = arith.negf %156 : vector<8x128xf32>
    %158 = math.exp %157 : vector<8x128xf32>
    %cst_52 = arith.constant 1.000000e+00 : f32
    %159 = vector.broadcast %cst_52 : f32 to vector<8x128xf32>
    %160 = arith.addf %159, %158 : vector<8x128xf32>
    %161 = arith.divf %159, %160 : vector<8x128xf32>
    %162 = vector.extract_strided_slice %155 {offsets = [0, 0], sizes = [8, 64], strides = [1, 1]} : vector<8x128xf32> to vector<8x64xf32>
    %163 = vector.extract_strided_slice %155 {offsets = [0, 64], sizes = [8, 64], strides = [1, 1]} : vector<8x128xf32> to vector<8x64xf32>
    %164 = vector.extract_strided_slice %161 {offsets = [0, 0], sizes = [8, 64], strides = [1, 1]} : vector<8x128xf32> to vector<8x64xf32>
    %cst_53 = arith.constant 2.000000e+00 : f32
    %165 = vector.broadcast %cst_53 : f32 to vector<8x64xf32>
    %166 = arith.mulf %165, %164 : vector<8x64xf32>
    %cst_54 = arith.constant 1.000000e+00 : f32
    %167 = vector.broadcast %cst_54 : f32 to vector<8x64xf32>
    %168 = arith.subf %166, %167 : vector<8x64xf32>
    %169 = vector.extract_strided_slice %161 {offsets = [0, 64], sizes = [8, 64], strides = [1, 1]} : vector<8x128xf32> to vector<8x64xf32>
    %170 = arith.mulf %163, %140 : vector<8x64xf32>
    %171 = arith.mulf %162, %168 : vector<8x64xf32>
    %172 = arith.addf %170, %171 : vector<8x64xf32>
    %173 = math.tanh %172 : vector<8x64xf32>
    %174 = arith.mulf %169, %173 : vector<8x64xf32>
    %c5_i32 = arith.constant 5 : i32
    %c8_i32_55 = arith.constant 8 : i32
    %175 = arith.muli %c5_i32, %c8_i32_55 : i32
    %176 = arith.index_cast %175 : i32 to index
    %c0_56 = arith.constant 0 : index
    %177 = vector.load %arg7[%176, %c0_56] : memref<64x256xf32, #tpu.memory_space<vmem>>, vector<8x256xf32>
    %c0_57 = arith.constant 0 : index
    %c0_58 = arith.constant 0 : index
    %178 = vector.load %arg2[%c0_57, %c0_58] : memref<64x256xf32, #tpu.memory_space<vmem>>, vector<64x256xf32>
    %cst_59 = arith.constant dense<0.000000e+00> : vector<8x256xf32>
    %179 = tpu.matmul %174, %178, %cst_59 {dimension_numbers = #tpu.dot_dimension_numbers<[1], [0], [0], [1], [0, 0, 1, 1], [], []>} : vector<8x64xf32>, vector<64x256xf32>, vector<8x256xf32> -> vector<8x256xf32>
    %180 = arith.addf %177, %179 : vector<8x256xf32>
    %181 = vector.extract_strided_slice %180 {offsets = [0, 0], sizes = [8, 128], strides = [1, 1]} : vector<8x256xf32> to vector<8x128xf32>
    %182 = vector.extract_strided_slice %180 {offsets = [0, 128], sizes = [8, 128], strides = [1, 1]} : vector<8x256xf32> to vector<8x128xf32>
    %183 = arith.negf %181 : vector<8x128xf32>
    %184 = math.exp %183 : vector<8x128xf32>
    %cst_60 = arith.constant 1.000000e+00 : f32
    %185 = vector.broadcast %cst_60 : f32 to vector<8x128xf32>
    %186 = arith.addf %185, %184 : vector<8x128xf32>
    %187 = arith.divf %185, %186 : vector<8x128xf32>
    %188 = arith.mulf %182, %12 : vector<8x128xf32>
    %189 = arith.negf %188 : vector<8x128xf32>
    %190 = math.exp %189 : vector<8x128xf32>
    %cst_61 = arith.constant 1.000000e+00 : f32
    %191 = vector.broadcast %cst_61 : f32 to vector<8x128xf32>
    %192 = arith.addf %191, %190 : vector<8x128xf32>
    %193 = arith.divf %191, %192 : vector<8x128xf32>
    %194 = vector.extract_strided_slice %187 {offsets = [0, 0], sizes = [8, 64], strides = [1, 1]} : vector<8x128xf32> to vector<8x64xf32>
    %195 = vector.extract_strided_slice %187 {offsets = [0, 64], sizes = [8, 64], strides = [1, 1]} : vector<8x128xf32> to vector<8x64xf32>
    %196 = vector.extract_strided_slice %193 {offsets = [0, 0], sizes = [8, 64], strides = [1, 1]} : vector<8x128xf32> to vector<8x64xf32>
    %cst_62 = arith.constant 2.000000e+00 : f32
    %197 = vector.broadcast %cst_62 : f32 to vector<8x64xf32>
    %198 = arith.mulf %197, %196 : vector<8x64xf32>
    %cst_63 = arith.constant 1.000000e+00 : f32
    %199 = vector.broadcast %cst_63 : f32 to vector<8x64xf32>
    %200 = arith.subf %198, %199 : vector<8x64xf32>
    %201 = vector.extract_strided_slice %193 {offsets = [0, 64], sizes = [8, 64], strides = [1, 1]} : vector<8x128xf32> to vector<8x64xf32>
    %202 = arith.mulf %195, %172 : vector<8x64xf32>
    %203 = arith.mulf %194, %200 : vector<8x64xf32>
    %204 = arith.addf %202, %203 : vector<8x64xf32>
    %205 = math.tanh %204 : vector<8x64xf32>
    %206 = arith.mulf %201, %205 : vector<8x64xf32>
    %c6_i32 = arith.constant 6 : i32
    %c8_i32_64 = arith.constant 8 : i32
    %207 = arith.muli %c6_i32, %c8_i32_64 : i32
    %208 = arith.index_cast %207 : i32 to index
    %c0_65 = arith.constant 0 : index
    %209 = vector.load %arg7[%208, %c0_65] : memref<64x256xf32, #tpu.memory_space<vmem>>, vector<8x256xf32>
    %c0_66 = arith.constant 0 : index
    %c0_67 = arith.constant 0 : index
    %210 = vector.load %arg2[%c0_66, %c0_67] : memref<64x256xf32, #tpu.memory_space<vmem>>, vector<64x256xf32>
    %cst_68 = arith.constant dense<0.000000e+00> : vector<8x256xf32>
    %211 = tpu.matmul %206, %210, %cst_68 {dimension_numbers = #tpu.dot_dimension_numbers<[1], [0], [0], [1], [0, 0, 1, 1], [], []>} : vector<8x64xf32>, vector<64x256xf32>, vector<8x256xf32> -> vector<8x256xf32>
    %212 = arith.addf %209, %211 : vector<8x256xf32>
    %213 = vector.extract_strided_slice %212 {offsets = [0, 0], sizes = [8, 128], strides = [1, 1]} : vector<8x256xf32> to vector<8x128xf32>
    %214 = vector.extract_strided_slice %212 {offsets = [0, 128], sizes = [8, 128], strides = [1, 1]} : vector<8x256xf32> to vector<8x128xf32>
    %215 = arith.negf %213 : vector<8x128xf32>
    %216 = math.exp %215 : vector<8x128xf32>
    %cst_69 = arith.constant 1.000000e+00 : f32
    %217 = vector.broadcast %cst_69 : f32 to vector<8x128xf32>
    %218 = arith.addf %217, %216 : vector<8x128xf32>
    %219 = arith.divf %217, %218 : vector<8x128xf32>
    %220 = arith.mulf %214, %12 : vector<8x128xf32>
    %221 = arith.negf %220 : vector<8x128xf32>
    %222 = math.exp %221 : vector<8x128xf32>
    %cst_70 = arith.constant 1.000000e+00 : f32
    %223 = vector.broadcast %cst_70 : f32 to vector<8x128xf32>
    %224 = arith.addf %223, %222 : vector<8x128xf32>
    %225 = arith.divf %223, %224 : vector<8x128xf32>
    %226 = vector.extract_strided_slice %219 {offsets = [0, 0], sizes = [8, 64], strides = [1, 1]} : vector<8x128xf32> to vector<8x64xf32>
    %227 = vector.extract_strided_slice %219 {offsets = [0, 64], sizes = [8, 64], strides = [1, 1]} : vector<8x128xf32> to vector<8x64xf32>
    %228 = vector.extract_strided_slice %225 {offsets = [0, 0], sizes = [8, 64], strides = [1, 1]} : vector<8x128xf32> to vector<8x64xf32>
    %cst_71 = arith.constant 2.000000e+00 : f32
    %229 = vector.broadcast %cst_71 : f32 to vector<8x64xf32>
    %230 = arith.mulf %229, %228 : vector<8x64xf32>
    %cst_72 = arith.constant 1.000000e+00 : f32
    %231 = vector.broadcast %cst_72 : f32 to vector<8x64xf32>
    %232 = arith.subf %230, %231 : vector<8x64xf32>
    %233 = vector.extract_strided_slice %225 {offsets = [0, 64], sizes = [8, 64], strides = [1, 1]} : vector<8x128xf32> to vector<8x64xf32>
    %234 = arith.mulf %227, %204 : vector<8x64xf32>
    %235 = arith.mulf %226, %232 : vector<8x64xf32>
    %236 = arith.addf %234, %235 : vector<8x64xf32>
    %237 = math.tanh %236 : vector<8x64xf32>
    %238 = arith.mulf %233, %237 : vector<8x64xf32>
    %c7_i32 = arith.constant 7 : i32
    %c8_i32_73 = arith.constant 8 : i32
    %239 = arith.muli %c7_i32, %c8_i32_73 : i32
    %240 = arith.index_cast %239 : i32 to index
    %c0_74 = arith.constant 0 : index
    %241 = vector.load %arg7[%240, %c0_74] : memref<64x256xf32, #tpu.memory_space<vmem>>, vector<8x256xf32>
    %c0_75 = arith.constant 0 : index
    %c0_76 = arith.constant 0 : index
    %242 = vector.load %arg2[%c0_75, %c0_76] : memref<64x256xf32, #tpu.memory_space<vmem>>, vector<64x256xf32>
    %cst_77 = arith.constant dense<0.000000e+00> : vector<8x256xf32>
    %243 = tpu.matmul %238, %242, %cst_77 {dimension_numbers = #tpu.dot_dimension_numbers<[1], [0], [0], [1], [0, 0, 1, 1], [], []>} : vector<8x64xf32>, vector<64x256xf32>, vector<8x256xf32> -> vector<8x256xf32>
    %244 = arith.addf %241, %243 : vector<8x256xf32>
    %245 = vector.extract_strided_slice %244 {offsets = [0, 0], sizes = [8, 128], strides = [1, 1]} : vector<8x256xf32> to vector<8x128xf32>
    %246 = vector.extract_strided_slice %244 {offsets = [0, 128], sizes = [8, 128], strides = [1, 1]} : vector<8x256xf32> to vector<8x128xf32>
    %247 = arith.negf %245 : vector<8x128xf32>
    %248 = math.exp %247 : vector<8x128xf32>
    %cst_78 = arith.constant 1.000000e+00 : f32
    %249 = vector.broadcast %cst_78 : f32 to vector<8x128xf32>
    %250 = arith.addf %249, %248 : vector<8x128xf32>
    %251 = arith.divf %249, %250 : vector<8x128xf32>
    %252 = arith.mulf %246, %12 : vector<8x128xf32>
    %253 = arith.negf %252 : vector<8x128xf32>
    %254 = math.exp %253 : vector<8x128xf32>
    %cst_79 = arith.constant 1.000000e+00 : f32
    %255 = vector.broadcast %cst_79 : f32 to vector<8x128xf32>
    %256 = arith.addf %255, %254 : vector<8x128xf32>
    %257 = arith.divf %255, %256 : vector<8x128xf32>
    %258 = vector.extract_strided_slice %251 {offsets = [0, 0], sizes = [8, 64], strides = [1, 1]} : vector<8x128xf32> to vector<8x64xf32>
    %259 = vector.extract_strided_slice %251 {offsets = [0, 64], sizes = [8, 64], strides = [1, 1]} : vector<8x128xf32> to vector<8x64xf32>
    %260 = vector.extract_strided_slice %257 {offsets = [0, 0], sizes = [8, 64], strides = [1, 1]} : vector<8x128xf32> to vector<8x64xf32>
    %cst_80 = arith.constant 2.000000e+00 : f32
    %261 = vector.broadcast %cst_80 : f32 to vector<8x64xf32>
    %262 = arith.mulf %261, %260 : vector<8x64xf32>
    %cst_81 = arith.constant 1.000000e+00 : f32
    %263 = vector.broadcast %cst_81 : f32 to vector<8x64xf32>
    %264 = arith.subf %262, %263 : vector<8x64xf32>
    %265 = vector.extract_strided_slice %257 {offsets = [0, 64], sizes = [8, 64], strides = [1, 1]} : vector<8x128xf32> to vector<8x64xf32>
    %266 = arith.mulf %259, %236 : vector<8x64xf32>
    %267 = arith.mulf %258, %264 : vector<8x64xf32>
    %268 = arith.addf %266, %267 : vector<8x64xf32>
    %269 = math.tanh %268 : vector<8x64xf32>
    %270 = arith.mulf %265, %269 : vector<8x64xf32>
    %c8_i32_82 = arith.constant 8 : i32
    %c0_83 = arith.constant 0 : index
    %c0_84 = arith.constant 0 : index
    %271 = vector.load %arg4[%c0_83, %c0_84] : memref<64x128xf32, #tpu.memory_space<vmem>>, vector<64x128xf32>
    %cst_85 = arith.constant dense<0.000000e+00> : vector<8x128xf32>
    %272 = tpu.matmul %270, %271, %cst_85 {dimension_numbers = #tpu.dot_dimension_numbers<[1], [0], [0], [1], [0, 0, 1, 1], [], []>} : vector<8x64xf32>, vector<64x128xf32>, vector<8x128xf32> -> vector<8x128xf32>
    %c0_86 = arith.constant 0 : index
    %c0_87 = arith.constant 0 : index
    %273 = vector.load %arg5[%c0_86, %c0_87] : memref<1x128xf32, #tpu.memory_space<vmem>>, vector<1x128xf32>
    %274 = vector.broadcast %273 : vector<1x128xf32> to vector<8x128xf32>
    %275 = arith.addf %272, %274 : vector<8x128xf32>
    %c0_88 = arith.constant 0 : index
    %c0_89 = arith.constant 0 : index
    %276 = vector.load %arg6[%c0_88, %c0_89] : memref<8x128xf32, #tpu.memory_space<vmem>>, vector<8x128xf32>
    tpu.vector_store %arg6[%c0_88, %c0_89], %275 {strides = array<i32>} : memref<8x128xf32, #tpu.memory_space<vmem>>, vector<8x128xf32>,
    return
  }
}

</mosaic_0001>

<bundles_post_ra>
// kernel: tpu_custom_call.1
= control target key start
LH: loop header
LB: loop body
LE: loop exit
PB: predicated region body
PF: predicated region fallthrough
CT: control target
= control target key end

     0   :  { %11 = vsyncpa [#allocation4], 0  ;;  %s1812_s0 = inlined_call_operand.vmem [shape: f32[64,28], index: 0, kind: input, shape index: {}]   ;;  %s1813_s1 = inlined_call_operand.vmem [shape: f32[28,256], index: 1, kind: input, shape index: {}]   ;;  %s1814_s2 = inlined_call_operand.hbm [shape: f32[64,256], index: 2, kind: input, shape index: {}]   ;;  %s1815_s3 = inlined_call_operand.vmem [shape: f32[1,256], index: 3, kind: input, shape index: {}]   ;;  %s1816_s4 = inlined_call_operand.hbm [shape: f32[64,128], index: 4, kind: input, shape index: {}]   ;;  %s1817_s5 = inlined_call_operand.vmem [shape: f32[1,128], index: 5, kind: input, shape index: {}]   ;;  %s1818_s6 = inlined_call_operand.hbm [shape: f32[8,128], index: 6, kind: output, shape index: {}]  }
   0x1   :  { %12 = vsyncpa [#allocation7], 0 }
   0x2   :  { %13 = vsyncpa [#allocation5], 0  ;;  %s1427_s21 = smov [#allocation3]  }
   0x3   :  { %s23_s22 = sshll.u32 %s1427_s21, 4  ;;  %s24_s22 = int_to_ptr.vmem [resolvable:$true] %s23_s22 }
   0x4   :  { %s1369_s23 = scalar_lea.vmem %s24_s22, 2048  ;;  %p1374_p1 = scmp.lt.s32.totalorder %s24_s22, %s24_s22 }
   0x5   :  { %p1370_p0 = scmp.ne.s32.totalorder %s24_s22, %s1369_s23  ;;  %p1375_p2 = scmp.lt.s32.totalorder %s1369_s23, %s1369_s23 }
   0x7   :  { %p1376_p3 = por %p1375_p2, %p1374_p1 }
   0x9   :  { %p1377_p4 = pnand %p1376_p3, %p1370_p0 }
   0xb   :  { %1380 = shalt.err (!%p1377_p4)
}
   0xc   :  { %s1428_s24 = smov 256   ;;  %s1429_s25 = smov 16  }
   0xd   :  { %29 = dma.hbm_to_vmem [thread:$0]  %s1814_s2, 2048, %s24_s22, [#allocation4], %s1428_s24, %s1428_s24, %s1429_s25  }
   0xe   :  { %s1430_s28 = smov [#allocation6]  }
   0xf   :  { %s37_s29 = sshll.u32 %s1430_s28, 4  ;;  %s38_s29 = int_to_ptr.vmem [resolvable:$true] %s37_s29 }
  0x10   :  { %s1389_s30 = scalar_lea.vmem %s38_s29, 1024  ;;  %p1394_p6 = scmp.lt.s32.totalorder %s38_s29, %s38_s29 }
  0x11   :  { %p1390_p5 = scmp.ne.s32.totalorder %s38_s29, %s1389_s30  ;;  %p1395_p7 = scmp.lt.s32.totalorder %s1389_s30, %s1389_s30 }
  0x13   :  { %p1396_p8 = por %p1395_p7, %p1394_p6 }
  0x15   :  { %p1397_p9 = pnand %p1396_p8, %p1390_p5 }
  0x17   :  { %1400 = shalt.err (!%p1397_p9)
}
  0x18   :  { %s1431_s7 = smov 128   ;;  %s1432_s8 = smov 8  }
  0x19   :  { %43 = dma.hbm_to_vmem [thread:$0]  %s1816_s4, 1024, %s38_s29, [#allocation7], %s1431_s7, %s1431_s7, %s1432_s8  }
  0x1a   :  { %1421 = dma.done.wait [#allocation4], 2048  }
  0x1b   :  { %1422 = vsyncadd [#allocation4], 4294965248 }
  0x1c   :  { %1423 = dma.done.wait [#allocation7], 1024  }
  0x1d   :  { %1424 = vsyncadd [#allocation7], 4294966272  ;;  %v1433_v0 = vmov 0.0   ;;  %vm105_vm0 = vcmask 1043456   ;;  %v1481_v1 = vld [vmem:[#allocation3 + $0x78] sm:$0xff]  ;;  %v1483_v2 = vld [vmem:[#allocation3 + $0x70] sm:$0xff]  ;;  %v70_v26 = vlaneseq }
  0x1e   :  { %176 = vmatprep.mubr.f32.mxu0 %v1433_v0  ;;  %331 = vmatprep.mubr.f32.mxu1 %v1433_v0  ;;  %v1485_v3 = vld [vmem:[#allocation3 + $0x68] sm:$0xff]  ;;  %v1488_v4 = vld [vmem:[#allocation3 + $0x60] sm:$0xff]  ;;  %v67_v5 = vld [vmem:[%s1813_s1 + $0x38] sm:$0xf]  ;;  %vm80_vm1 = vcmask 228352   ;;  %v1434_v40 = vmov 1.0  }
  0x1f   :  { %283 = vmatprep.subr.mxu1 %v1481_v1  ;;  %1199 = vmatprep.subr.msk.mxu0 %vm105_vm0, %v67_v5  ;;  %v1494_v6 = vld [vmem:[#allocation3 + $0x58] sm:$0xff]  ;;  %v66_v7 = vld [vmem:[%s1813_s1 + $0x30] sm:$0xf]  ;;  %v65_v8 = vld [vmem:[%s1813_s1 + $0x28] sm:$0xff]  ;;  %v71_v27 = vshrl.u32 %v70_v26, 7  ;;  %v242_v33 = vand.u32 127, %v70_v26 }
  0x20   :  { %284 = vmatpush1.msra.mxu1 %v1483_v2  ;;  %1200 = vmatpush1.msk.msra.mxu0 %vm105_vm0, %v66_v7  ;;  %v1503_v9 = vld [vmem:[#allocation3 + $0x50] sm:$0xff]  ;;  %v64_v10 = vld [vmem:[%s1813_s1 + $0x20] sm:$0xff]  ;;  %v1509_v11 = vld [vmem:[#allocation3 + $0x48] sm:$0xff]  ;;  %vm263_vm3 = vcmask 523264   ;;  %vm1436_vm4 = vmmov 0   ;;  %s1437_s17 = smov [#allocation8]  }
  0x21   :  { %285 = vmatprep.subr.mxu1 %v1485_v3  ;;  %138 = vmatprep.subr.mxu0 %v65_v8  ;;  %v63_v12 = vld [vmem:[%s1813_s1 + $0x18] sm:$0xff]  ;;  %v62_v13 = vld [vmem:[%s1813_s1 + $0x10] sm:$0xff]  ;;  %v1518_v14 = vld [vmem:[#allocation3 + $0x40] sm:$0xff]  ;;  %v72_v28 = vsub.s32 0, %v71_v27  ;;  %v76_v31 = vsub.s32 1, %v71_v27  ;;  %vm243_vm2 = vcmp.lt.s32.totalorder %v242_v33, 64 }
  0x22   :  { %286 = vmatpush1.msra.mxu1 %v1488_v4  ;;  %139 = vmatpush1.msra.mxu0 %v64_v10  ;;  %v61_v15 = vld [vmem:[%s1813_s1 + $0x8] sm:$0xff]  ;;  %v1524_v16 = vld [vmem:[#allocation3 + $0x38] sm:$0xff]  ;;  %v60_v17 = vld [vmem:[%s1813_s1] sm:$0xff]  ;;  %v1603_v41 = vsel %vm243_vm2, 2.0, %v1434_v40  ;;  %s1189_s18 = sshll.u32 %s1437_s17, 4  ;;  %s1190_s18 = int_to_ptr.vmem [resolvable:$true] %s1189_s18 }
  0x23   :  { %287 = vmatprep.subr.mxu1 %v1494_v6  ;;  %140 = vmatprep.subr.mxu0 %v63_v12  ;;  %v1530_v18 = vld [vmem:[#allocation3 + $0x30] sm:$0xff]  ;;  %v52_v19 = vld [vmem:[%s1812_s0] sm:$0xff]  ;;  %v1536_v20 = vld [vmem:[#allocation3 + $0x28] sm:$0xff]  ;;  %s1401_s19 = scalar_lea.vmem %s1190_s18, 128  ;;  %p1406_p11 = scmp.lt.s32.totalorder %s1190_s18, %s1190_s18 }
  0x24   :  { %288 = vmatpush1.msra.mxu1 %v1503_v9  ;;  %141 = vmatpush1.msra.mxu0 %v62_v13  ;;  %v1539_v21 = vld [vmem:[#allocation3 + $0x20] sm:$0xff]  ;;  %v1543_v22 = vld [vmem:[#allocation3 + $0x18] sm:$0xff]  ;;  %v1546_v23 = vld [vmem:[#allocation3 + $0x10] sm:$0xff]  ;;  %p1402_p10 = scmp.ne.s32.totalorder %s1190_s18, %s1401_s19  ;;  %p1407_p12 = scmp.lt.s32.totalorder %s1401_s19, %s1401_s19 }
  0x25   :  { %289 = vmatprep.subr.mxu1 %v1509_v11  ;;  %142 = vmatprep.subr.mxu0 %v61_v15  ;;  %v1550_v24 = vld [vmem:[#allocation3 + $0x8] sm:$0xff]  ;;  %v1554_v25 = vld [vmem:[#allocation3] sm:$0xff] }
  0x26   :  { %290 = vmatpush1.msra.mxu1 %v1518_v14  ;;  %143 = vmatpush1.msra.mxu0 %v60_v17  ;;  %v68_v29 = vld [vmem:[%s1815_s3] sm:$0x3]  ;;  %s1435_s3 = smov 64   ;;  %v53_v56 = vld [vmem:[%s1812_s0 + $0x8] sm:$0xff]  ;;  %p1408_p13 = por %p1407_p12, %p1406_p11 }
  0x27   :  { %291 = vmatprep.subr.mxu1 %v1524_v16  ;;  %1201 = vmatmul.mubr.msk.f32.vlgmr.msra.gmra.mxu0 %vm80_vm1, %v52_v19  ;;  %v1597_v30 = vrot.slane %v68_v29, %v72_v28  ;;  %v1600_v35 = vrot.slane %v68_v29, %v76_v31  ;;  %v56_v40 = vld [vmem:[%s1812_s0 + $0x20] sm:$0xff] }
  0x28   :  { %292 = vmatpush1.msra.mxu1 %v1530_v18  ;;  %182 = vmatprep.mubr.f32.mxu0 %v1433_v0  ;;  %p1409_p0 = pnand %p1408_p13, %p1402_p10 }
  0x29   :  { %293 = vmatprep.subr.mxu1 %v1536_v20  ;;  %491 = vmatprep.subr.mxu0 %v1481_v1 }
  0x2a   :  { %294 = vmatpush1.msra.mxu1 %v1539_v21  ;;  %492 = vmatpush1.msra.mxu0 %v1483_v2 }
  0x2b   :  { %295 = vmatprep.subr.mxu1 %v1543_v22  ;;  %493 = vmatprep.subr.mxu0 %v1485_v3 }
  0x2c   :  { %296 = vmatpush1.msra.mxu1 %v1546_v23  ;;  %494 = vmatpush1.msra.mxu0 %v1488_v4 }
  0x2d   :  { %297 = vmatprep.subr.mxu1 %v1550_v24  ;;  %495 = vmatprep.subr.mxu0 %v1494_v6 }
  0x2e   :  { %298 = vmatpush1.msra.mxu1 %v1554_v25  ;;  %496 = vmatpush1.msra.mxu0 %v1503_v9 }
  0x2f   :  { %332 = vmatmul.mubr.f32.vlgmr.msra.gmra.mxu1 %v1433_v0  ;;  %387 = vmatprep.subr.mxu1 %v1481_v1 }
  0x30   :  { %388 = vmatpush1.msra.mxu1 %v1483_v2  ;;  %435 = vmatprep.mubr.f32.mxu1 %v1433_v0 }
  0x31   :  { %389 = vmatprep.subr.mxu1 %v1485_v3  ;;  %497 = vmatprep.subr.mxu0 %v1509_v11 }
  0x32   :  { %390 = vmatpush1.msra.mxu1 %v1488_v4  ;;  %498 = vmatpush1.msra.mxu0 %v1518_v14 }
  0x33   :  { %391 = vmatprep.subr.mxu1 %v1494_v6  ;;  %499 = vmatprep.subr.mxu0 %v1524_v16 }
  0x34   :  { %392 = vmatpush1.msra.mxu1 %v1503_v9  ;;  %500 = vmatpush1.msra.mxu0 %v1530_v18 }
  0x35   :  { %393 = vmatprep.subr.mxu1 %v1509_v11  ;;  %501 = vmatprep.subr.mxu0 %v1536_v20 }
  0x36   :  { %394 = vmatpush1.msra.mxu1 %v1518_v14  ;;  %502 = vmatpush1.msra.mxu0 %v1539_v21 }
  0x37   :  { %395 = vmatprep.subr.mxu1 %v1524_v16  ;;  %503 = vmatprep.subr.mxu0 %v1543_v22 }
  0x38   :  { %396 = vmatpush1.msra.mxu1 %v1530_v18  ;;  %504 = vmatpush1.msra.mxu0 %v1546_v23 }
  0x39   :  { %397 = vmatprep.subr.mxu1 %v1536_v20  ;;  %505 = vmatprep.subr.mxu0 %v1550_v24 }
  0x3a   :  { %398 = vmatpush1.msra.mxu1 %v1539_v21  ;;  %506 = vmatpush1.msra.mxu0 %v1554_v25 }
  0x3b   :  { %399 = vmatprep.subr.mxu1 %v1543_v22  ;;  %699 = vmatprep.subr.mxu0 %v1481_v1 }
  0x3c   :  { %400 = vmatpush1.msra.mxu1 %v1546_v23  ;;  %1202 = vmatmul.mubr.msk.f32.gmra.mxu0 %vm80_vm1, %v53_v56 }
  0x3d   :  { %401 = vmatprep.subr.mxu1 %v1550_v24  ;;  %188 = vmatprep.mubr.f32.mxu0 %v1433_v0 }
  0x3e   :  { %402 = vmatpush1.msra.mxu1 %v1554_v25 }
  0x3f   :  { %595 = vmatprep.subr.mxu1 %v1481_v1 }
  0xe7   :  { %v178_v32 = vpop.f32.mrf.mxu0 }
  0xe8   :  { %v179_v34 = vadd.f32 %v178_v32, %v1597_v30 }
  0xe9   :  { %v180_v36 = vpop.f32.mrf.mxu0 }
  0xea   :  { %v181_v38 = vadd.f32 %v180_v36, %v1600_v35 }
  0xef   :  { %v333_v37 = vpop.f32.mrf.mxu1 }
  0xf0   :  { %v338_v39 = vadd.f32 %v333_v37, %v179_v34 }
  0xf1   :  { %v335_v42 = vpop.f32.mrf.mxu1 }
  0xf2   :  { %v339_v43 = vadd.f32 %v335_v42, %v181_v38  ;;  %v1209_v44 = vmul.f32 -1.442695, %v338_v39  ;;  %v54_v38 = vld [vmem:[%s1812_s0 + $0x10] sm:$0xff]  ;;  %v55_v39 = vld [vmem:[%s1812_s0 + $0x18] sm:$0xff]  ;;  %v57_v42 = vld [vmem:[%s1812_s0 + $0x28] sm:$0xff] }
  0xf3   :  { %1203 = vmatmul.mubr.msk.f32.gmra.mxu0 %vm80_vm1, %v54_v38 }
  0xf4   :  { %v346_v45 = vmul.f32 %v339_v43, %v1603_v41  ;;  %1281 = vpow2.f32 %v1209_v44  ;;  %194 = vmatprep.mubr.f32.mxu0 %v1433_v0  ;;  %v58_v43 = vld [vmem:[%s1812_s0 + $0x30] sm:$0xff]  ;;  %v59_v44 = vld [vmem:[%s1812_s0 + $0x38] sm:$0xff] }
  0xf6   :  { %v1210_v46 = vmul.f32 -1.442695, %v346_v45 }
  0xf7   :  { %1204 = vmatmul.mubr.msk.f32.gmra.mxu0 %vm80_vm1, %v55_v39 }
  0xf8   :  { %1283 = vpow2.f32 %v1210_v46  ;;  %200 = vmatprep.mubr.f32.mxu0 %v1433_v0 }
  0xfb   :  { %1205 = vmatmul.mubr.msk.f32.gmra.mxu0 %vm80_vm1, %v56_v40 }
  0xfc   :  { %v184_v63 = vpop.f32.mrf.mxu0  ;;  %206 = vmatprep.mubr.f32.mxu0 %v1433_v0 }
  0xfd   :  { %v185_v5 = vadd.f32 %v184_v63, %v1597_v30 }
  0xfe   :  { %v186_v7 = vpop.f32.mrf.mxu0 }
  0xff   :  { %v187_v10 = vadd.f32 %v186_v7, %v1600_v35  ;;  %1206 = vmatmul.mubr.msk.f32.gmra.mxu0 %vm80_vm1, %v57_v42 }
 0x100   :  { %212 = vmatprep.mubr.f32.mxu0 %v1433_v0 }
 0x101   :  { %v1282_v47 = vpop.eup %1281 }
 0x102   :  { %v343_v50 = vadd.f32 1.0, %v1282_v47 }
 0x103   :  { %1207 = vmatmul.mubr.msk.f32.gmra.mxu0 %vm80_vm1, %v58_v43 }
 0x104   :  { %218 = vmatprep.mubr.f32.mxu0 %v1433_v0 }
 0x105   :  { %v1284_v48 = vpop.eup %1283 }
 0x106   :  { %v350_v49 = vadd.f32 1.0, %v1284_v48 }
 0x107   :  { %1208 = vmatmul.mubr.msk.f32.gmra.mxu0 %vm80_vm1, %v59_v44 }
 0x108   :  { %1285 = vrcp.f32 %v350_v49  ;;  %539 = vmatprep.mubr.f32.mxu0 %v1433_v0 }
 0x109   :  { %1287 = vrcp.f32 %v343_v50 }
 0x115   :  { %v1286_v51 = vpop.eup %1285 }
 0x116   :  { %v353_v52 = vmul.f32 2.0, %v1286_v51  ;;  %v1288_v54 = vpop.eup %1287 }
 0x117   :  { %v355_v57 = vmul.f32 0.0, %v1288_v54 }
 0x118   :  { %v1211_v53 = vadd.f32 -1.0, %v353_v52 }
 0x11a   :  { %v356_v55 = vmul.f32 %v1288_v54, %v1211_v53 }
 0x11c   :  { %358 = vrot.lane.b32.xlu0 %v356_v55, %s1435_s3 }
 0x18e   :  { %v359_v58 = vpop.permute.xlu0 %358 }
 0x18f   :  { %v1612_v59 = vadd.f32 %v359_v58, %v355_v57 }
 0x191   :  { %1289 = vtanh.f32 %v1612_v59 }
 0x19e   :  { %v1290_v60 = vpop.eup %1289 }
 0x19f   :  { %v363_v61 = vmul.f32 %v1290_v60, %v1286_v51 }
 0x1a1   :  { %367 = vrot.lane.b32.xlu0 %v363_v61, %s1435_s3 }
 0x1b3   :  { %v190_v51 = vpop.f32.mrf.mxu0 }
 0x1b4   :  { %v191_v63 = vadd.f32 %v190_v51, %v1597_v30 }
 0x1b5   :  { %v192_v52 = vpop.f32.mrf.mxu0 }
 0x1b6   :  { %v193_v7 = vadd.f32 %v192_v52, %v1600_v35 }
 0x1b7   :  { %v196_v53 = vpop.f32.mrf.mxu0 }
 0x1b8   :  { %v197_v43 = vadd.f32 %v196_v53, %v1597_v30 }
 0x1b9   :  { %v198_v54 = vpop.f32.mrf.mxu0 }
 0x1bb   :  { %v1688_v55 = vpop.f32.mrf.mxu0 }
 0x1bd   :  { %v1690_v56 = vpop.f32.mrf.mxu0 }
 0x1bf   :  { %v1692_v57 = vpop.f32.mrf.mxu0 }
 0x1c1   :  { %v1694_v58 = vpop.f32.mrf.mxu0 }
 0x213   :  { %v368_v62 = vpop.permute.xlu0 %367 }
 0x214   :  { %1212 = vmatmul.mubr.msk.f32.vlgmr.msra.gmra.mxu1 %vm263_vm3, %v368_v62 }
 0x215   :  { %596 = vmatpush1.msra.mxu1 %v1483_v2  ;;  %643 = vmatprep.mubr.f32.mxu1 %v1433_v0 }
 0x216   :  { %597 = vmatprep.subr.mxu1 %v1485_v3 }
 0x217   :  { %598 = vmatpush1.msra.mxu1 %v1488_v4 }
 0x218   :  { %599 = vmatprep.subr.mxu1 %v1494_v6 }
 0x219   :  { %600 = vmatpush1.msra.mxu1 %v1503_v9 }
 0x21a   :  { %601 = vmatprep.subr.mxu1 %v1509_v11 }
 0x21b   :  { %602 = vmatpush1.msra.mxu1 %v1518_v14 }
 0x21c   :  { %603 = vmatprep.subr.mxu1 %v1524_v16 }
 0x21d   :  { %604 = vmatpush1.msra.mxu1 %v1530_v18 }
 0x21e   :  { %605 = vmatprep.subr.mxu1 %v1536_v20 }
 0x21f   :  { %606 = vmatpush1.msra.mxu1 %v1539_v21 }
 0x220   :  { %607 = vmatprep.subr.mxu1 %v1543_v22 }
 0x221   :  { %608 = vmatpush1.msra.mxu1 %v1546_v23 }
 0x222   :  { %609 = vmatprep.subr.mxu1 %v1550_v24 }
 0x223   :  { %610 = vmatpush1.msra.mxu1 %v1554_v25 }
 0x224   :  { %803 = vmatprep.subr.mxu1 %v1481_v1 }
 0x2d4   :  { %v437_v8 = vpop.f32.mrf.mxu1 }
 0x2d5   :  { %v442_v12 = vadd.f32 %v437_v8, %v185_v5 }
 0x2d6   :  { %v439_v13 = vpop.f32.mrf.mxu1 }
 0x2d7   :  { %v443_v15 = vadd.f32 %v439_v13, %v187_v10  ;;  %v1213_v17 = vmul.f32 -1.442695, %v442_v12 }
 0x2d9   :  { %v450_v19 = vmul.f32 %v443_v15, %v1603_v41  ;;  %1291 = vpow2.f32 %v1213_v17 }
 0x2db   :  { %v1214_v26 = vmul.f32 -1.442695, %v450_v19 }
 0x2dd   :  { %1293 = vpow2.f32 %v1214_v26 }
 0x2e6   :  { %v1292_v27 = vpop.eup %1291 }
 0x2e7   :  { %v447_v31 = vadd.f32 1.0, %v1292_v27 }
 0x2ea   :  { %v1294_v28 = vpop.eup %1293 }
 0x2eb   :  { %v454_v29 = vadd.f32 1.0, %v1294_v28 }
 0x2ed   :  { %1295 = vrcp.f32 %v454_v29 }
 0x2ee   :  { %1297 = vrcp.f32 %v447_v31 }
 0x2fa   :  { %v1296_v32 = vpop.eup %1295 }
 0x2fb   :  { %v457_v33 = vmul.f32 2.0, %v1296_v32  ;;  %v1298_v36 = vpop.eup %1297 }
 0x2fc   :  { %v459_v45 = vmul.f32 %v1298_v36, %v1612_v59  ;;  %v1696_v59 = vpop.f32.mrf.mxu0 }
 0x2fd   :  { %v1215_v34 = vadd.f32 -1.0, %v457_v33 }
 0x2fe   :  { %v1698_v60 = vpop.f32.mrf.mxu0 }
 0x2ff   :  { %v460_v37 = vmul.f32 %v1298_v36, %v1215_v34 }
 0x300   :  { %v1700_v61 = vpop.f32.mrf.mxu0 }
 0x301   :  { %462 = vrot.lane.b32.xlu1 %v460_v37, %s1435_s3 }
 0x302   :  { %v1702_v62 = vpop.f32.mrf.mxu0 }
 0x373   :  { %v463_v46 = vpop.permute.xlu1 %462 }
 0x374   :  { %v465_v47 = vadd.f32 %v463_v46, %v459_v45  ;;  %v199_v45 = vadd.f32 %v198_v54, %v1600_v35 }
 0x376   :  { %1299 = vtanh.f32 %v465_v47 }
 0x383   :  { %v1300_v48 = vpop.eup %1299 }
 0x384   :  { %v467_v49 = vmul.f32 %v1300_v48, %v1296_v32 }
 0x386   :  { %471 = vrot.lane.b32.xlu1 %v467_v49, %s1435_s3 }
 0x3f8   :  { %v472_v50 = vpop.permute.xlu1 %471 }
 0x3f9   :  { %1216 = vmatmul.mubr.msk.f32.vlgmr.msra.gmra.mxu0 %vm263_vm3, %v472_v50 }
 0x3fa   :  { %700 = vmatpush1.msra.mxu0 %v1483_v2  ;;  %747 = vmatprep.mubr.f32.mxu0 %v1433_v0 }
 0x3fb   :  { %701 = vmatprep.subr.mxu0 %v1485_v3 }
 0x3fc   :  { %702 = vmatpush1.msra.mxu0 %v1488_v4 }
 0x3fd   :  { %703 = vmatprep.subr.mxu0 %v1494_v6 }
 0x3fe   :  { %704 = vmatpush1.msra.mxu0 %v1503_v9 }
 0x3ff   :  { %705 = vmatprep.subr.mxu0 %v1509_v11 }
 0x400   :  { %706 = vmatpush1.msra.mxu0 %v1518_v14 }
 0x401   :  { %707 = vmatprep.subr.mxu0 %v1524_v16 }
 0x402   :  { %708 = vmatpush1.msra.mxu0 %v1530_v18 }
 0x403   :  { %709 = vmatprep.subr.mxu0 %v1536_v20 }
 0x404   :  { %710 = vmatpush1.msra.mxu0 %v1539_v21 }
 0x405   :  { %711 = vmatprep.subr.mxu0 %v1543_v22 }
 0x406   :  { %712 = vmatpush1.msra.mxu0 %v1546_v23 }
 0x407   :  { %713 = vmatprep.subr.mxu0 %v1550_v24 }
 0x408   :  { %714 = vmatpush1.msra.mxu0 %v1554_v25 }
 0x409   :  { %907 = vmatprep.subr.mxu0 %v1481_v1 }
 0x4b9   :  { %v541_v5 = vpop.f32.mrf.mxu0 }
 0x4ba   :  { %v546_v8 = vadd.f32 %v541_v5, %v191_v63 }
 0x4bb   :  { %v543_v10 = vpop.f32.mrf.mxu0 }
 0x4bc   :  { %v547_v12 = vadd.f32 %v543_v10, %v193_v7  ;;  %v1217_v13 = vmul.f32 -1.442695, %v546_v8 }
 0x4be   :  { %v554_v15 = vmul.f32 %v547_v12, %v1603_v41  ;;  %1301 = vpow2.f32 %v1217_v13 }
 0x4c0   :  { %v1218_v17 = vmul.f32 -1.442695, %v554_v15 }
 0x4c2   :  { %1303 = vpow2.f32 %v1218_v17 }
 0x4cb   :  { %v1302_v19 = vpop.eup %1301 }
 0x4cc   :  { %v551_v28 = vadd.f32 1.0, %v1302_v19 }
 0x4cf   :  { %v1304_v26 = vpop.eup %1303 }
 0x4d0   :  { %v558_v27 = vadd.f32 1.0, %v1304_v26 }
 0x4d2   :  { %1305 = vrcp.f32 %v558_v27  ;;  %v203_v27 = vadd.f32 %v1688_v55, %v1597_v30 }
 0x4d3   :  { %1307 = vrcp.f32 %v551_v28 }
 0x4df   :  { %v1306_v29 = vpop.eup %1305 }
 0x4e0   :  { %v561_v31 = vmul.f32 2.0, %v1306_v29  ;;  %v1308_v33 = vpop.eup %1307 }
 0x4e1   :  { %v563_v36 = vmul.f32 %v1308_v33, %v465_v47 }
 0x4e2   :  { %v1219_v32 = vadd.f32 -1.0, %v561_v31 }
 0x4e4   :  { %v564_v34 = vmul.f32 %v1308_v33, %v1219_v32 }
 0x4e6   :  { %566 = vrot.lane.b32.xlu0 %v564_v34, %s1435_s3 }
 0x558   :  { %v567_v37 = vpop.permute.xlu0 %566 }
 0x559   :  { %v569_v38 = vadd.f32 %v567_v37, %v563_v36 }
 0x55b   :  { %1309 = vtanh.f32 %v569_v38 }
 0x568   :  { %v1310_v39 = vpop.eup %1309 }
 0x569   :  { %v571_v40 = vmul.f32 %v1310_v39, %v1306_v29  ;;  %v205_v29 = vadd.f32 %v1690_v56, %v1600_v35 }
 0x56b   :  { %575 = vrot.lane.b32.xlu1 %v571_v40, %s1435_s3 }
 0x5dd   :  { %v576_v42 = vpop.permute.xlu1 %575 }
 0x5de   :  { %1220 = vmatmul.mubr.msk.f32.vlgmr.msra.gmra.mxu1 %vm263_vm3, %v576_v42 }
 0x5df   :  { %804 = vmatpush1.msra.mxu1 %v1483_v2  ;;  %851 = vmatprep.mubr.f32.mxu1 %v1433_v0 }
 0x5e0   :  { %805 = vmatprep.subr.mxu1 %v1485_v3 }
 0x5e1   :  { %806 = vmatpush1.msra.mxu1 %v1488_v4 }
 0x5e2   :  { %807 = vmatprep.subr.mxu1 %v1494_v6 }
 0x5e3   :  { %808 = vmatpush1.msra.mxu1 %v1503_v9 }
 0x5e4   :  { %809 = vmatprep.subr.mxu1 %v1509_v11 }
 0x5e5   :  { %810 = vmatpush1.msra.mxu1 %v1518_v14 }
 0x5e6   :  { %811 = vmatprep.subr.mxu1 %v1524_v16 }
 0x5e7   :  { %812 = vmatpush1.msra.mxu1 %v1530_v18 }
 0x5e8   :  { %813 = vmatprep.subr.mxu1 %v1536_v20 }
 0x5e9   :  { %814 = vmatpush1.msra.mxu1 %v1539_v21 }
 0x5ea   :  { %815 = vmatprep.subr.mxu1 %v1543_v22 }
 0x5eb   :  { %816 = vmatpush1.msra.mxu1 %v1546_v23 }
 0x5ec   :  { %817 = vmatprep.subr.mxu1 %v1550_v24 }
 0x5ed   :  { %818 = vmatpush1.msra.mxu1 %v1554_v25 }
 0x5ee   :  { %1011 = vmatprep.subr.mxu1 %v1481_v1 }
 0x69e   :  { %v645_v44 = vpop.f32.mrf.mxu1 }
 0x69f   :  { %v650_v46 = vadd.f32 %v645_v44, %v197_v43 }
 0x6a0   :  { %v647_v47 = vpop.f32.mrf.mxu1 }
 0x6a1   :  { %v651_v48 = vadd.f32 %v647_v47, %v199_v45  ;;  %v1221_v49 = vmul.f32 -1.442695, %v650_v46 }
 0x6a3   :  { %v658_v50 = vmul.f32 %v651_v48, %v1603_v41  ;;  %1311 = vpow2.f32 %v1221_v49 }
 0x6a5   :  { %v1222_v51 = vmul.f32 -1.442695, %v658_v50 }
 0x6a7   :  { %1313 = vpow2.f32 %v1222_v51 }
 0x6b0   :  { %v1312_v52 = vpop.eup %1311 }
 0x6b1   :  { %v655_v7 = vadd.f32 1.0, %v1312_v52 }
 0x6b4   :  { %v1314_v63 = vpop.eup %1313 }
 0x6b5   :  { %v662_v5 = vadd.f32 1.0, %v1314_v63 }
 0x6b7   :  { %1315 = vrcp.f32 %v662_v5 }
 0x6b8   :  { %1317 = vrcp.f32 %v655_v7 }
 0x6c4   :  { %v1316_v1 = vpop.eup %1315 }
 0x6c5   :  { %v665_v53 = vmul.f32 2.0, %v1316_v1  ;;  %v1318_v10 = vpop.eup %1317 }
 0x6c6   :  { %v667_v12 = vmul.f32 %v1318_v10, %v569_v38 }
 0x6c7   :  { %v1223_v8 = vadd.f32 -1.0, %v665_v53 }
 0x6c9   :  { %v668_v54 = vmul.f32 %v1318_v10, %v1223_v8  ;;  %v215_v10 = vadd.f32 %v1696_v59, %v1597_v30 }
 0x6cb   :  { %670 = vrot.lane.b32.xlu0 %v668_v54, %s1435_s3 }
 0x73d   :  { %v671_v13 = vpop.permute.xlu0 %670 }
 0x73e   :  { %v673_v15 = vadd.f32 %v671_v13, %v667_v12  ;;  %v217_v12 = vadd.f32 %v1698_v60, %v1600_v35 }
 0x740   :  { %1319 = vtanh.f32 %v673_v15 }
 0x74d   :  { %v1320_v17 = vpop.eup %1319 }
 0x74e   :  { %v675_v19 = vmul.f32 %v1320_v17, %v1316_v1 }
 0x750   :  { %679 = vrot.lane.b32.xlu1 %v675_v19, %s1435_s3 }
 0x7c2   :  { %v680_v26 = vpop.permute.xlu1 %679 }
 0x7c3   :  { %1224 = vmatmul.mubr.msk.f32.vlgmr.msra.gmra.mxu0 %vm263_vm3, %v680_v26 }
 0x7c4   :  { %908 = vmatpush1.msra.mxu0 %v1483_v2  ;;  %955 = vmatprep.mubr.f32.mxu0 %v1433_v0 }
 0x7c5   :  { %909 = vmatprep.subr.mxu0 %v1485_v3 }
 0x7c6   :  { %910 = vmatpush1.msra.mxu0 %v1488_v4 }
 0x7c7   :  { %911 = vmatprep.subr.mxu0 %v1494_v6 }
 0x7c8   :  { %912 = vmatpush1.msra.mxu0 %v1503_v9 }
 0x7c9   :  { %913 = vmatprep.subr.mxu0 %v1509_v11 }
 0x7ca   :  { %914 = vmatpush1.msra.mxu0 %v1518_v14 }
 0x7cb   :  { %915 = vmatprep.subr.mxu0 %v1524_v16 }
 0x7cc   :  { %916 = vmatpush1.msra.mxu0 %v1530_v18 }
 0x7cd   :  { %917 = vmatprep.subr.mxu0 %v1536_v20 }
 0x7ce   :  { %918 = vmatpush1.msra.mxu0 %v1539_v21 }
 0x7cf   :  { %919 = vmatprep.subr.mxu0 %v1543_v22 }
 0x7d0   :  { %920 = vmatpush1.msra.mxu0 %v1546_v23 }
 0x7d1   :  { %921 = vmatprep.subr.mxu0 %v1550_v24 }
 0x7d2   :  { %922 = vmatpush1.msra.mxu0 %v1554_v25 }
 0x7d3   :  { %1251 = vmatprep.subr.mxu0 %v1433_v0 }
 0x883   :  { %v749_v28 = vpop.f32.mrf.mxu0 }
 0x884   :  { %v754_v31 = vadd.f32 %v749_v28, %v203_v27 }
 0x885   :  { %v751_v32 = vpop.f32.mrf.mxu0 }
 0x886   :  { %v755_v33 = vadd.f32 %v751_v32, %v205_v29  ;;  %v1225_v34 = vmul.f32 -1.442695, %v754_v31 }
 0x888   :  { %v762_v36 = vmul.f32 %v755_v33, %v1603_v41  ;;  %1321 = vpow2.f32 %v1225_v34 }
 0x88a   :  { %v1226_v37 = vmul.f32 -1.442695, %v762_v36 }
 0x88c   :  { %1323 = vpow2.f32 %v1226_v37 }
 0x895   :  { %v1322_v38 = vpop.eup %1321 }
 0x896   :  { %v759_v42 = vadd.f32 1.0, %v1322_v38 }
 0x899   :  { %v1324_v39 = vpop.eup %1323 }
 0x89a   :  { %v766_v40 = vadd.f32 1.0, %v1324_v39 }
 0x89c   :  { %1325 = vrcp.f32 %v766_v40 }
 0x89d   :  { %1327 = vrcp.f32 %v759_v42 }
 0x8a9   :  { %v1326_v55 = vpop.eup %1325 }
 0x8aa   :  { %v769_v43 = vmul.f32 2.0, %v1326_v55  ;;  %v1328_v45 = vpop.eup %1327 }
 0x8ab   :  { %v771_v46 = vmul.f32 %v1328_v45, %v673_v15 }
 0x8ac   :  { %v1227_v44 = vadd.f32 -1.0, %v769_v43  ;;  %v221_v43 = vadd.f32 %v1700_v61, %v1597_v30 }
 0x8ae   :  { %v772_v56 = vmul.f32 %v1328_v45, %v1227_v44  ;;  %v223_v45 = vadd.f32 %v1702_v62, %v1600_v35  ;;  %v1099_v62 = vld [vmem:[#allocation6 + $0x38] sm:$0xff] }
 0x8b0   :  { %774 = vrot.lane.b32.xlu0 %v772_v56, %s1435_s3 }
 0x922   :  { %v775_v47 = vpop.permute.xlu0 %774 }
 0x923   :  { %v777_v48 = vadd.f32 %v775_v47, %v771_v46 }
 0x925   :  { %1329 = vtanh.f32 %v777_v48 }
 0x932   :  { %v1330_v49 = vpop.eup %1329 }
 0x933   :  { %v779_v50 = vmul.f32 %v1330_v49, %v1326_v55 }
 0x935   :  { %783 = vrot.lane.b32.xlu1 %v779_v50, %s1435_s3 }
 0x9a7   :  { %v784_v51 = vpop.permute.xlu1 %783 }
 0x9a8   :  { %1228 = vmatmul.mubr.msk.f32.vlgmr.msra.gmra.mxu1 %vm263_vm3, %v784_v51 }
 0x9a9   :  { %1012 = vmatpush1.msra.mxu1 %v1483_v2  ;;  %1059 = vmatprep.mubr.f32.mxu1 %v1433_v0  ;;  %v209_v2 = vadd.f32 %v1692_v57, %v1597_v30 }
 0x9aa   :  { %1013 = vmatprep.subr.mxu1 %v1485_v3 }
 0x9ab   :  { %1014 = vmatpush1.msra.mxu1 %v1488_v4  ;;  %v211_v4 = vadd.f32 %v1694_v58, %v1600_v35 }
 0x9ac   :  { %1015 = vmatprep.subr.mxu1 %v1494_v6 }
 0x9ad   :  { %1016 = vmatpush1.msra.mxu1 %v1503_v9 }
 0x9ae   :  { %1017 = vmatprep.subr.mxu1 %v1509_v11 }
 0x9af   :  { %1018 = vmatpush1.msra.mxu1 %v1518_v14 }
 0x9b0   :  { %1019 = vmatprep.subr.mxu1 %v1524_v16 }
 0x9b1   :  { %1020 = vmatpush1.msra.mxu1 %v1530_v18 }
 0x9b2   :  { %1021 = vmatprep.subr.mxu1 %v1536_v20 }
 0x9b3   :  { %1022 = vmatpush1.msra.mxu1 %v1539_v21 }
 0x9b4   :  { %1023 = vmatprep.subr.mxu1 %v1543_v22 }
 0x9b5   :  { %1024 = vmatpush1.msra.mxu1 %v1546_v23 }
 0x9b6   :  { %1025 = vmatprep.subr.mxu1 %v1550_v24 }
 0x9b7   :  { %1026 = vmatpush1.msra.mxu1 %v1554_v25 }
 0xa68   :  { %v853_v3 = vpop.f32.mrf.mxu1 }
 0xa69   :  { %v858_v6 = vadd.f32 %v853_v3, %v209_v2 }
 0xa6a   :  { %v855_v9 = vpop.f32.mrf.mxu1 }
 0xa6b   :  { %v859_v11 = vadd.f32 %v855_v9, %v211_v4  ;;  %v1229_v14 = vmul.f32 -1.442695, %v858_v6 }
 0xa6d   :  { %v866_v16 = vmul.f32 %v859_v11, %v1603_v41  ;;  %1331 = vpow2.f32 %v1229_v14  ;;  %v1098_v11 = vld [vmem:[#allocation6 + $0x30] sm:$0xff]  ;;  %v1096_v14 = vld [vmem:[#allocation6 + $0x20] sm:$0xff] }
 0xa6f   :  { %v1230_v18 = vmul.f32 -1.442695, %v866_v16  ;;  %v1095_v16 = vld [vmem:[#allocation6 + $0x18] sm:$0xff] }
 0xa71   :  { %1333 = vpow2.f32 %v1230_v18  ;;  %v1094_v18 = vld [vmem:[#allocation6 + $0x10] sm:$0xff] }
 0xa7a   :  { %v1332_v20 = vpop.eup %1331 }
 0xa7b   :  { %v863_v23 = vadd.f32 1.0, %v1332_v20  ;;  %v1093_v20 = vld [vmem:[#allocation6 + $0x8] sm:$0xff] }
 0xa7e   :  { %v1334_v21 = vpop.eup %1333 }
 0xa7f   :  { %v870_v22 = vadd.f32 1.0, %v1334_v21  ;;  %v1092_v21 = vld [vmem:[#allocation6] sm:$0xff] }
 0xa81   :  { %1335 = vrcp.f32 %v870_v22 }
 0xa82   :  { %1337 = vrcp.f32 %v863_v23 }
 0xa8e   :  { %v1336_v24 = vpop.eup %1335 }
 0xa8f   :  { %v873_v25 = vmul.f32 2.0, %v1336_v24  ;;  %v1338_v52 = vpop.eup %1337 }
 0xa90   :  { %v875_v63 = vmul.f32 %v1338_v52, %v777_v48 }
 0xa91   :  { %v1231_v57 = vadd.f32 -1.0, %v873_v25 }
 0xa93   :  { %v876_v58 = vmul.f32 %v1338_v52, %v1231_v57 }
 0xa95   :  { %878 = vrot.lane.b32.xlu0 %v876_v58, %s1435_s3  ;;  %v1240_v58 = vld [vmem:[%s1817_s5] ss:$0 sm:$0xff] }
 0xb07   :  { %v879_v5 = vpop.permute.xlu0 %878 }
 0xb08   :  { %v881_v7 = vadd.f32 %v879_v5, %v875_v63 }
 0xb0a   :  { %1339 = vtanh.f32 %v881_v7 }
 0xb17   :  { %v1340_v1 = vpop.eup %1339 }
 0xb18   :  { %v883_v53 = vmul.f32 %v1340_v1, %v1336_v24 }
 0xb1a   :  { %887 = vrot.lane.b32.xlu1 %v883_v53, %s1435_s3 }
 0xb8c   :  { %v888_v8 = vpop.permute.xlu1 %887 }
 0xb8d   :  { %1232 = vmatmul.mubr.msk.f32.vlgmr.msra.gmra.mxu0 %vm263_vm3, %v888_v8 }
 0xb8e   :  { %1252 = vmatpush3.msra.mxu0 %v1099_v62  ;;  %1267 = vmatprep.mubr.msk.f32.mxu0 %vm1436_vm4, %v1433_v0 }
 0xb8f   :  { %1253 = vmatprep.subr.mxu0 %v1433_v0 }
 0xb90   :  { %1254 = vmatpush3.msra.mxu0 %v1098_v11 }
 0xb91   :  { %1255 = vmatprep.subr.mxu0 %v1433_v0 }
 0xc4d   :  { %v957_v54 = vpop.f32.mrf.mxu0 }
 0xc4e   :  { %v962_v13 = vadd.f32 %v957_v54, %v215_v10 }
 0xc4f   :  { %v959_v15 = vpop.f32.mrf.mxu0 }
 0xc50   :  { %v963_v17 = vadd.f32 %v959_v15, %v217_v12  ;;  %v1233_v19 = vmul.f32 -1.442695, %v962_v13 }
 0xc52   :  { %v970_v26 = vmul.f32 %v963_v17, %v1603_v41  ;;  %1341 = vpow2.f32 %v1233_v19 }
 0xc54   :  { %v1234_v27 = vmul.f32 -1.442695, %v970_v26 }
 0xc56   :  { %1343 = vpow2.f32 %v1234_v27 }
 0xc5f   :  { %v1342_v28 = vpop.eup %1341 }
 0xc60   :  { %v967_v32 = vadd.f32 1.0, %v1342_v28 }
 0xc63   :  { %v1344_v29 = vpop.eup %1343 }
 0xc64   :  { %v974_v31 = vadd.f32 1.0, %v1344_v29 }
 0xc66   :  { %1345 = vrcp.f32 %v974_v31 }
 0xc67   :  { %1347 = vrcp.f32 %v967_v32 }
 0xc73   :  { %v1346_v59 = vpop.eup %1345 }
 0xc74   :  { %v977_v33 = vmul.f32 2.0, %v1346_v59  ;;  %v1348_v36 = vpop.eup %1347 }
 0xc75   :  { %v979_v37 = vmul.f32 %v1348_v36, %v881_v7 }
 0xc76   :  { %v1235_v34 = vadd.f32 -1.0, %v977_v33 }
 0xc78   :  { %v980_v60 = vmul.f32 %v1348_v36, %v1235_v34 }
 0xc7a   :  { %982 = vrot.lane.b32.xlu0 %v980_v60, %s1435_s3 }
 0xcec   :  { %v983_v38 = vpop.permute.xlu0 %982 }
 0xced   :  { %v985_v39 = vadd.f32 %v983_v38, %v979_v37 }
 0xcef   :  { %1349 = vtanh.f32 %v985_v39 }
 0xcfc   :  { %v1350_v40 = vpop.eup %1349 }
 0xcfd   :  { %v987_v42 = vmul.f32 %v1350_v40, %v1346_v59 }
 0xcff   :  { %991 = vrot.lane.b32.xlu1 %v987_v42, %s1435_s3 }
 0xd71   :  { %v992_v55 = vpop.permute.xlu1 %991 }
 0xd72   :  { %1236 = vmatmul.mubr.msk.f32.vlgmr.msra.gmra.mxu1 %vm263_vm3, %v992_v55 }
 0xe32   :  { %v1061_v44 = vpop.f32.mrf.mxu1 }
 0xe33   :  { %v1066_v56 = vadd.f32 %v1061_v44, %v221_v43 }
 0xe34   :  { %v1063_v46 = vpop.f32.mrf.mxu1 }
 0xe35   :  { %v1067_v47 = vadd.f32 %v1063_v46, %v223_v45  ;;  %v1237_v48 = vmul.f32 -1.442695, %v1066_v56 }
 0xe37   :  { %v1074_v49 = vmul.f32 %v1067_v47, %v1603_v41  ;;  %1351 = vpow2.f32 %v1237_v48  ;;  %v1097_v41 = vld [vmem:[#allocation6 + $0x28] sm:$0xff] }
 0xe38   :  { %1256 = vmatpush3.msra.mxu0 %v1097_v41 }
 0xe39   :  { %v1238_v50 = vmul.f32 -1.442695, %v1074_v49  ;;  %1257 = vmatprep.subr.mxu0 %v1433_v0 }
 0xe3a   :  { %1258 = vmatpush3.msra.mxu0 %v1096_v14 }
 0xe3b   :  { %1353 = vpow2.f32 %v1238_v50  ;;  %1259 = vmatprep.subr.mxu0 %v1433_v0 }
 0xe3c   :  { %1260 = vmatpush3.msra.mxu0 %v1095_v16 }
 0xe3d   :  { %1261 = vmatprep.subr.mxu0 %v1433_v0 }
 0xe3e   :  { %1262 = vmatpush3.msra.mxu0 %v1094_v18 }
 0xe3f   :  { %1263 = vmatprep.subr.mxu0 %v1433_v0 }
 0xe40   :  { %1264 = vmatpush3.msra.mxu0 %v1093_v20 }
 0xe41   :  { %1265 = vmatprep.subr.mxu0 %v1433_v0 }
 0xe42   :  { %1266 = vmatpush3.msra.mxu0 %v1092_v21 }
 0xe44   :  { %v1352_v51 = vpop.eup %1351 }
 0xe45   :  { %v1071_v4 = vadd.f32 1.0, %v1352_v51 }
 0xe48   :  { %v1354_v2 = vpop.eup %1353 }
 0xe49   :  { %v1078_v3 = vadd.f32 1.0, %v1354_v2 }
 0xe4b   :  { %1355 = vrcp.f32 %v1078_v3 }
 0xe4c   :  { %1357 = vrcp.f32 %v1071_v4 }
 0xe58   :  { %v1356_v30 = vpop.eup %1355 }
 0xe59   :  { %v1081_v61 = vmul.f32 2.0, %v1356_v30  ;;  %v1358_v9 = vpop.eup %1357 }
 0xe5a   :  { %v1083_v22 = vmul.f32 %v1358_v9, %v985_v39 }
 0xe5b   :  { %v1239_v6 = vadd.f32 -1.0, %v1081_v61 }
 0xe5d   :  { %v1084_v35 = vmul.f32 %v1358_v9, %v1239_v6 }
 0xe5f   :  { %1086 = vrot.lane.b32.xlu0 %v1084_v35, %s1435_s3 }
 0xed1   :  { %v1087_v23 = vpop.permute.xlu0 %1086 }
 0xed2   :  { %v1089_v24 = vadd.f32 %v1087_v23, %v1083_v22 }
 0xed4   :  { %1359 = vtanh.f32 %v1089_v24 }
 0xee1   :  { %v1360_v25 = vpop.eup %1359 }
 0xee2   :  { %v1091_v57 = vmul.f32 %v1360_v25, %v1356_v30 }
 0xee4   :  { %1108 = vrot.lane.b32.xlu1 %v1091_v57, %s1435_s3 }
 0xf56   :  { %v1109_v52 = vpop.permute.xlu1 %1108 }
 0xf57   :  { %1268 = vmatmul.mubr.msk.f32.vlgmr.msra.gmra.mxu0 %vm263_vm3, %v1109_v52 }
0x1017   :  { %v1178_v63 = vpop.f32.mrf.mxu0 }
0x1018   :  { %v1179_v0 = vadd.f32 %v1240_v58, %v1178_v63 }
0x1019   :  { %v1269_v5 = vpop.f32.mrf.mxu0 }
0x101a   :  { %1182 = vst [vmem:[#allocation8] sm:$0xff] %v1179_v0 }
0x101b   :  { %1412 = shalt.err (!%p1409_p0)
}
0x101c   :  { %1192 = dma.vmem_to_hbm [thread:$0]  %s1190_s18, 128, %s1818_s6, [#allocation5]  }
0x101d   :  { %1425 = dma.done.wait [#allocation5], 128  }
0x101e   :  { %1426 = vsyncadd [#allocation5], 4294967168 }
0x101f   :  { %1196 = vsyncpa [#allocation4], 1 }
0x1020   :  { %1197 = vsyncpa [#allocation7], 1 }
0x1021   :  { %1198 = vsyncpa [#allocation5], 1 }

</bundles_post_ra>
